<compile_context>
chip_gen: v7x
topology: tpu7x:2x2x1
jax: 0.10.0
libtpu: 0.0.40
codegen_flags: <defaults>
</compile_context>

<pallas_src>
import jax
import jax.numpy as jnp
from jax.experimental import pallas as pl
from jax.experimental.pallas import tpu as pltpu

_LANES = 128  # channel block size (TPU lane width)


def _xcorr_depthwise_kernel(z_ref, x_ref, o_ref, zb_ref, xf_ref=None):
    # z_ref : (Hz, Wz, C)        template tile (batch squeezed, one 128-ch block)
    # x_ref : (Hx, Wx, C)        search tile
    # o_ref : (Ho, Wo, C)        depthwise correlation output
    # zb_ref: (Hz, Wz, Wo, C)    f32 scratch: taps pre-broadcast over Wo
    # xf_ref: (Hx, Wx, C) f32    scratch: x cast once (only when x is not f32)
    Hz, Wz, C = z_ref.shape
    Hx, Wx, _ = x_ref.shape
    Ho, Wo, _ = o_ref.shape

    # ---- once per grid step -------------------------------------------------
    # Pre-broadcast every template tap z[u, v, :] across the output width.
    for u in range(Hz):
        for v in range(Wz):
            tap = z_ref[u, v:v + 1, :].astype(jnp.float32)        # (1, C)
            zb_ref[u, v, :, :] = jnp.broadcast_to(tap, (Wo, C))

    # Cast the whole search tile to f32 exactly once (skip when already f32).
    if xf_ref is None:
        src = x_ref                       # input is already f32
    else:
        xf_ref[...] = x_ref[...].astype(jnp.float32)
        src = xf_ref

    # ---- output row blocks (register-resident accumulators) -----------------
    # Live-vreg budget: acc (RB*cWo) + mul temp (RB*cWo) + rolled tall slab
    # ((RB+Hz-1)*cWx) + one tap (cWo) must stay comfortably under 64 vregs.
    cWo = -(-Wo // 8)
    cWx = -(-Wx // 8)
    RB = min(Ho, 16)
    while RB > 1 and 2 * RB * cWo + (RB + Hz - 1) * cWx + cWo > 52:
        RB -= 1

    h0 = 0
    while h0 < Ho:                        # static Python loop (fully unrolled)
        rb = min(RB, Ho - h0)             # exact static tail block: no recompute
        acc = jnp.zeros((rb, Wo, C), jnp.float32)
        for v in range(Wz):               # unrolled
            # Tall slab (rows h0 .. h0+rb+Hz-2), W-shifted ONCE per v (XLU);
            # reloading per v (instead of holding it across the v loop) keeps
            # register pressure low -- the extra vlds sit on a slack slot.
            slab = src[h0:h0 + rb + Hz - 1, :, :].astype(jnp.float32)
            if v:
                # roll by -v: column j of the result is column (j + v) of the
                # slab; wrapped columns land at j >= Wo and are discarded.
                slab = pltpu.roll(slab, Wx - v, axis=1)
            win = slab[:, :Wo, :]
            for u in range(Hz):           # unrolled; row slice is free
                acc = acc + win[u:u + rb] * zb_ref[u, v]
        o_ref[h0:h0 + rb, :, :] = acc.astype(o_ref.dtype)
        h0 += rb


def mask_forward(z_f, x_f):
    """Depthwise cross-correlation, PyTorch NCHW in / NCHW out.

    z_f: (B, C, Hz, Wz)  template features
    x_f: (B, C, Hx, Wx)  search features
    returns: (B, C, Hx-Hz+1, Wx-Wz+1)
    """
    B, C, Hz, Wz = z_f.shape
    Bx, Cx, Hx, Wx = x_f.shape
    assert B == Bx and C == Cx, "batch / channel mismatch"
    assert Hz <= Hx and Wz <= Wx, "template larger than search region"
    Ho, Wo = Hx - Hz + 1, Wx - Wz + 1

    # NCHW -> NHWC (channels on lanes); pad C up to a multiple of 128 only when
    # needed so every VPU op / store is lane-dense.
    # TODO(synk): if the surrounding model keeps features NHWC end-to-end these
    # transposes (extra HBM round trips on a memory-bound boundary) disappear.
    cpad = -(-C // _LANES) * _LANES
    z_nhwc = jnp.transpose(z_f, (0, 2, 3, 1))
    x_nhwc = jnp.transpose(x_f, (0, 2, 3, 1))
    if cpad != C:
        pad = ((0, 0), (0, 0), (0, 0), (0, cpad - C))
        z_nhwc = jnp.pad(z_nhwc, pad)
        x_nhwc = jnp.pad(x_nhwc, pad)

    scratch_shapes = [pltpu.VMEM((Hz, Wz, Wo, _LANES), jnp.float32)]
    if x_nhwc.dtype != jnp.float32:
        scratch_shapes.append(pltpu.VMEM((Hx, Wx, _LANES), jnp.float32))

    # TODO(synk): when B * (cpad//128) == 1 on dual-TC chips (v7x), add a grid
    # axis over output-row blocks (x via memory_space=pl.ANY + manual halo DMA)
    # so both TensorCores get work.
    grid = (B, cpad // _LANES)
    out_nhwc = pl.pallas_call(
        _xcorr_depthwise_kernel,
        out_shape=jax.ShapeDtypeStruct((B, Ho, Wo, cpad), x_f.dtype),
        grid_spec=pltpu.PrefetchScalarGridSpec(
            num_scalar_prefetch=0,
            grid=grid,
            in_specs=[
                pl.BlockSpec((None, Hz, Wz, _LANES), lambda b, c: (b, 0, 0, c)),
                pl.BlockSpec((None, Hx, Wx, _LANES), lambda b, c: (b, 0, 0, c)),
            ],
            out_specs=pl.BlockSpec((None, Ho, Wo, _LANES),
                                   lambda b, c: (b, 0, 0, c)),
            scratch_shapes=scratch_shapes,
        ),
        compiler_params=pltpu.CompilerParams(
            dimension_semantics=("parallel", "parallel")),
    )(z_nhwc, x_nhwc)

    # drop channel padding, NHWC -> NCHW
    out_nhwc = out_nhwc[..., :C]
    return jnp.transpose(out_nhwc, (0, 3, 1, 2))


def _reference(z_f, x_f):
    """Pure-JAX reference: depthwise xcorr via explicit loops."""
    B, C, Hz, Wz = z_f.shape
    _, _, Hx, Wx = x_f.shape
    Ho, Wo = Hx - Hz + 1, Wx - Wz + 1
    out = jnp.zeros((B, C, Ho, Wo), jnp.float32)
    for u in range(Hz):
        for v in range(Wz):
            out = out + (x_f[:, :, u:u + Ho, v:v + Wo].astype(jnp.float32)
                         * z_f[:, :, u:u + 1, v:v + 1].astype(jnp.float32))
    return out.astype(x_f.dtype)


if __name__ == "__main__":
    key = jax.random.PRNGKey(0)
    kz, kx = jax.random.split(key)

    B, C = 2, 4
    Hz = Wz = 4      # template feature spatial size
    Hx = Wx = 8      # search feature spatial size

    z_f = jax.random.normal(kz, (B, C, Hz, Wz), dtype=jnp.float32)
    x_f = jax.random.normal(kx, (B, C, Hx, Wx), dtype=jnp.float32)

    out = jax.jit(mask_forward)(z_f, x_f)
    out = jax.block_until_ready(out)

    ref = _reference(z_f, x_f)
    assert out.shape == (B, C, Hx - Hz + 1, Wx - Wz + 1), out.shape
    assert jnp.allclose(out, ref, atol=1e-5, rtol=1e-5), "mismatch vs reference"

    print("KERNEL_OK")
</pallas_src>

<mosaic_0001>
module attributes {stable_mosaic.version = 11 : i64} {
  func.func @_xcorr_depthwise_kernel(%arg0: i32, %arg1: i32, %arg2: memref<1x4x4x128xf32, #tpu.memory_space<vmem>>, %arg3: memref<1x8x8x128xf32, #tpu.memory_space<vmem>>, %arg4: memref<1x5x5x128xf32, #tpu.memory_space<vmem>>, %arg5: memref<4x4x5x128xf32, #tpu.memory_space<vmem>>) attributes {dimension_semantics = [#tpu.dimension_semantics<parallel>, #tpu.dimension_semantics<parallel>], iteration_bounds = array<i64: 2, 1>, scalar_prefetch = 0 : i64, scratch_operands = 1 : i64, tpu.core_type = #tpu.core_type<tc>, window_params = [{transform_indices = @transform_0, window_bounds = array<i64: 1, 4, 4, 128>}, {transform_indices = @transform_1, window_bounds = array<i64: 1, 8, 8, 128>}, {transform_indices = @transform_2, window_bounds = array<i64: 1, 5, 5, 128>}]} {
    %c0 = arith.constant 0 : index
    %c0_0 = arith.constant 0 : index
    %c0_1 = arith.constant 0 : index
    %c0_2 = arith.constant 0 : index
    %0 = vector.load %arg2[%c0, %c0_0, %c0_1, %c0_2] : memref<1x4x4x128xf32, #tpu.memory_space<vmem>>, vector<1x1x1x128xf32>
    %1 = vector.shape_cast %0 : vector<1x1x1x128xf32> to vector<1x128xf32>
    %2 = vector.shape_cast %1 : vector<1x128xf32> to vector<1x128xf32>
    %3 = vector.broadcast %2 : vector<1x128xf32> to vector<5x128xf32>
    %c0_3 = arith.constant 0 : index
    %c0_4 = arith.constant 0 : index
    %c0_5 = arith.constant 0 : index
    %c0_6 = arith.constant 0 : index
    %4 = vector.load %arg5[%c0_3, %c0_4, %c0_5, %c0_6] : memref<4x4x5x128xf32, #tpu.memory_space<vmem>>, vector<1x1x5x128xf32>
    %5 = vector.shape_cast %4 : vector<1x1x5x128xf32> to vector<5x128xf32>
    %6 = vector.shape_cast %3 : vector<5x128xf32> to vector<1x1x5x128xf32>
    tpu.vector_store %arg5[%c0_3, %c0_4, %c0_5, %c0_6], %6 {strides = array<i32>} : memref<4x4x5x128xf32, #tpu.memory_space<vmem>>, vector<1x1x5x128xf32>,
    %c0_7 = arith.constant 0 : index
    %c0_8 = arith.constant 0 : index
    %c1 = arith.constant 1 : index
    %c0_9 = arith.constant 0 : index
    %7 = vector.load %arg2[%c0_7, %c0_8, %c1, %c0_9] : memref<1x4x4x128xf32, #tpu.memory_space<vmem>>, vector<1x1x1x128xf32>
    %8 = vector.shape_cast %7 : vector<1x1x1x128xf32> to vector<1x128xf32>
    %9 = vector.shape_cast %8 : vector<1x128xf32> to vector<1x128xf32>
    %10 = vector.broadcast %9 : vector<1x128xf32> to vector<5x128xf32>
    %c0_10 = arith.constant 0 : index
    %c1_11 = arith.constant 1 : index
    %c0_12 = arith.constant 0 : index
    %c0_13 = arith.constant 0 : index
    %11 = vector.load %arg5[%c0_10, %c1_11, %c0_12, %c0_13] : memref<4x4x5x128xf32, #tpu.memory_space<vmem>>, vector<1x1x5x128xf32>
    %12 = vector.shape_cast %11 : vector<1x1x5x128xf32> to vector<5x128xf32>
    %13 = vector.shape_cast %10 : vector<5x128xf32> to vector<1x1x5x128xf32>
    tpu.vector_store %arg5[%c0_10, %c1_11, %c0_12, %c0_13], %13 {strides = array<i32>} : memref<4x4x5x128xf32, #tpu.memory_space<vmem>>, vector<1x1x5x128xf32>,
    %c0_14 = arith.constant 0 : index
    %c0_15 = arith.constant 0 : index
    %c2 = arith.constant 2 : index
    %c0_16 = arith.constant 0 : index
    %14 = vector.load %arg2[%c0_14, %c0_15, %c2, %c0_16] : memref<1x4x4x128xf32, #tpu.memory_space<vmem>>, vector<1x1x1x128xf32>
    %15 = vector.shape_cast %14 : vector<1x1x1x128xf32> to vector<1x128xf32>
    %16 = vector.shape_cast %15 : vector<1x128xf32> to vector<1x128xf32>
    %17 = vector.broadcast %16 : vector<1x128xf32> to vector<5x128xf32>
    %c0_17 = arith.constant 0 : index
    %c2_18 = arith.constant 2 : index
    %c0_19 = arith.constant 0 : index
    %c0_20 = arith.constant 0 : index
    %18 = vector.load %arg5[%c0_17, %c2_18, %c0_19, %c0_20] : memref<4x4x5x128xf32, #tpu.memory_space<vmem>>, vector<1x1x5x128xf32>
    %19 = vector.shape_cast %18 : vector<1x1x5x128xf32> to vector<5x128xf32>
    %20 = vector.shape_cast %17 : vector<5x128xf32> to vector<1x1x5x128xf32>
    tpu.vector_store %arg5[%c0_17, %c2_18, %c0_19, %c0_20], %20 {strides = array<i32>} : memref<4x4x5x128xf32, #tpu.memory_space<vmem>>, vector<1x1x5x128xf32>,
    %c0_21 = arith.constant 0 : index
    %c0_22 = arith.constant 0 : index
    %c3 = arith.constant 3 : index
    %c0_23 = arith.constant 0 : index
    %21 = vector.load %arg2[%c0_21, %c0_22, %c3, %c0_23] : memref<1x4x4x128xf32, #tpu.memory_space<vmem>>, vector<1x1x1x128xf32>
    %22 = vector.shape_cast %21 : vector<1x1x1x128xf32> to vector<1x128xf32>
    %23 = vector.shape_cast %22 : vector<1x128xf32> to vector<1x128xf32>
    %24 = vector.broadcast %23 : vector<1x128xf32> to vector<5x128xf32>
    %c0_24 = arith.constant 0 : index
    %c3_25 = arith.constant 3 : index
    %c0_26 = arith.constant 0 : index
    %c0_27 = arith.constant 0 : index
    %25 = vector.load %arg5[%c0_24, %c3_25, %c0_26, %c0_27] : memref<4x4x5x128xf32, #tpu.memory_space<vmem>>, vector<1x1x5x128xf32>
    %26 = vector.shape_cast %25 : vector<1x1x5x128xf32> to vector<5x128xf32>
    %27 = vector.shape_cast %24 : vector<5x128xf32> to vector<1x1x5x128xf32>
    tpu.vector_store %arg5[%c0_24, %c3_25, %c0_26, %c0_27], %27 {strides = array<i32>} : memref<4x4x5x128xf32, #tpu.memory_space<vmem>>, vector<1x1x5x128xf32>,
    %c0_28 = arith.constant 0 : index
    %c1_29 = arith.constant 1 : index
    %c0_30 = arith.constant 0 : index
    %c0_31 = arith.constant 0 : index
    %28 = vector.load %arg2[%c0_28, %c1_29, %c0_30, %c0_31] : memref<1x4x4x128xf32, #tpu.memory_space<vmem>>, vector<1x1x1x128xf32>
    %29 = vector.shape_cast %28 : vector<1x1x1x128xf32> to vector<1x128xf32>
    %30 = vector.shape_cast %29 : vector<1x128xf32> to vector<1x128xf32>
    %31 = vector.broadcast %30 : vector<1x128xf32> to vector<5x128xf32>
    %c1_32 = arith.constant 1 : index
    %c0_33 = arith.constant 0 : index
    %c0_34 = arith.constant 0 : index
    %c0_35 = arith.constant 0 : index
    %32 = vector.load %arg5[%c1_32, %c0_33, %c0_34, %c0_35] : memref<4x4x5x128xf32, #tpu.memory_space<vmem>>, vector<1x1x5x128xf32>
    %33 = vector.shape_cast %32 : vector<1x1x5x128xf32> to vector<5x128xf32>
    %34 = vector.shape_cast %31 : vector<5x128xf32> to vector<1x1x5x128xf32>
    tpu.vector_store %arg5[%c1_32, %c0_33, %c0_34, %c0_35], %34 {strides = array<i32>} : memref<4x4x5x128xf32, #tpu.memory_space<vmem>>, vector<1x1x5x128xf32>,
    %c0_36 = arith.constant 0 : index
    %c1_37 = arith.constant 1 : index
    %c1_38 = arith.constant 1 : index
    %c0_39 = arith.constant 0 : index
    %35 = vector.load %arg2[%c0_36, %c1_37, %c1_38, %c0_39] : memref<1x4x4x128xf32, #tpu.memory_space<vmem>>, vector<1x1x1x128xf32>
    %36 = vector.shape_cast %35 : vector<1x1x1x128xf32> to vector<1x128xf32>
    %37 = vector.shape_cast %36 : vector<1x128xf32> to vector<1x128xf32>
    %38 = vector.broadcast %37 : vector<1x128xf32> to vector<5x128xf32>
    %c1_40 = arith.constant 1 : index
    %c1_41 = arith.constant 1 : index
    %c0_42 = arith.constant 0 : index
    %c0_43 = arith.constant 0 : index
    %39 = vector.load %arg5[%c1_40, %c1_41, %c0_42, %c0_43] : memref<4x4x5x128xf32, #tpu.memory_space<vmem>>, vector<1x1x5x128xf32>
    %40 = vector.shape_cast %39 : vector<1x1x5x128xf32> to vector<5x128xf32>
    %41 = vector.shape_cast %38 : vector<5x128xf32> to vector<1x1x5x128xf32>
    tpu.vector_store %arg5[%c1_40, %c1_41, %c0_42, %c0_43], %41 {strides = array<i32>} : memref<4x4x5x128xf32, #tpu.memory_space<vmem>>, vector<1x1x5x128xf32>,
    %c0_44 = arith.constant 0 : index
    %c1_45 = arith.constant 1 : index
    %c2_46 = arith.constant 2 : index
    %c0_47 = arith.constant 0 : index
    %42 = vector.load %arg2[%c0_44, %c1_45, %c2_46, %c0_47] : memref<1x4x4x128xf32, #tpu.memory_space<vmem>>, vector<1x1x1x128xf32>
    %43 = vector.shape_cast %42 : vector<1x1x1x128xf32> to vector<1x128xf32>
    %44 = vector.shape_cast %43 : vector<1x128xf32> to vector<1x128xf32>
    %45 = vector.broadcast %44 : vector<1x128xf32> to vector<5x128xf32>
    %c1_48 = arith.constant 1 : index
    %c2_49 = arith.constant 2 : index
    %c0_50 = arith.constant 0 : index
    %c0_51 = arith.constant 0 : index
    %46 = vector.load %arg5[%c1_48, %c2_49, %c0_50, %c0_51] : memref<4x4x5x128xf32, #tpu.memory_space<vmem>>, vector<1x1x5x128xf32>
    %47 = vector.shape_cast %46 : vector<1x1x5x128xf32> to vector<5x128xf32>
    %48 = vector.shape_cast %45 : vector<5x128xf32> to vector<1x1x5x128xf32>
    tpu.vector_store %arg5[%c1_48, %c2_49, %c0_50, %c0_51], %48 {strides = array<i32>} : memref<4x4x5x128xf32, #tpu.memory_space<vmem>>, vector<1x1x5x128xf32>,
    %c0_52 = arith.constant 0 : index
    %c1_53 = arith.constant 1 : index
    %c3_54 = arith.constant 3 : index
    %c0_55 = arith.constant 0 : index
    %49 = vector.load %arg2[%c0_52, %c1_53, %c3_54, %c0_55] : memref<1x4x4x128xf32, #tpu.memory_space<vmem>>, vector<1x1x1x128xf32>
    %50 = vector.shape_cast %49 : vector<1x1x1x128xf32> to vector<1x128xf32>
    %51 = vector.shape_cast %50 : vector<1x128xf32> to vector<1x128xf32>
    %52 = vector.broadcast %51 : vector<1x128xf32> to vector<5x128xf32>
    %c1_56 = arith.constant 1 : index
    %c3_57 = arith.constant 3 : index
    %c0_58 = arith.constant 0 : index
    %c0_59 = arith.constant 0 : index
    %53 = vector.load %arg5[%c1_56, %c3_57, %c0_58, %c0_59] : memref<4x4x5x128xf32, #tpu.memory_space<vmem>>, vector<1x1x5x128xf32>
    %54 = vector.shape_cast %53 : vector<1x1x5x128xf32> to vector<5x128xf32>
    %55 = vector.shape_cast %52 : vector<5x128xf32> to vector<1x1x5x128xf32>
    tpu.vector_store %arg5[%c1_56, %c3_57, %c0_58, %c0_59], %55 {strides = array<i32>} : memref<4x4x5x128xf32, #tpu.memory_space<vmem>>, vector<1x1x5x128xf32>,
    %c0_60 = arith.constant 0 : index
    %c2_61 = arith.constant 2 : index
    %c0_62 = arith.constant 0 : index
    %c0_63 = arith.constant 0 : index
    %56 = vector.load %arg2[%c0_60, %c2_61, %c0_62, %c0_63] : memref<1x4x4x128xf32, #tpu.memory_space<vmem>>, vector<1x1x1x128xf32>
    %57 = vector.shape_cast %56 : vector<1x1x1x128xf32> to vector<1x128xf32>
    %58 = vector.shape_cast %57 : vector<1x128xf32> to vector<1x128xf32>
    %59 = vector.broadcast %58 : vector<1x128xf32> to vector<5x128xf32>
    %c2_64 = arith.constant 2 : index
    %c0_65 = arith.constant 0 : index
    %c0_66 = arith.constant 0 : index
    %c0_67 = arith.constant 0 : index
    %60 = vector.load %arg5[%c2_64, %c0_65, %c0_66, %c0_67] : memref<4x4x5x128xf32, #tpu.memory_space<vmem>>, vector<1x1x5x128xf32>
    %61 = vector.shape_cast %60 : vector<1x1x5x128xf32> to vector<5x128xf32>
    %62 = vector.shape_cast %59 : vector<5x128xf32> to vector<1x1x5x128xf32>
    tpu.vector_store %arg5[%c2_64, %c0_65, %c0_66, %c0_67], %62 {strides = array<i32>} : memref<4x4x5x128xf32, #tpu.memory_space<vmem>>, vector<1x1x5x128xf32>,
    %c0_68 = arith.constant 0 : index
    %c2_69 = arith.constant 2 : index
    %c1_70 = arith.constant 1 : index
    %c0_71 = arith.constant 0 : index
    %63 = vector.load %arg2[%c0_68, %c2_69, %c1_70, %c0_71] : memref<1x4x4x128xf32, #tpu.memory_space<vmem>>, vector<1x1x1x128xf32>
    %64 = vector.shape_cast %63 : vector<1x1x1x128xf32> to vector<1x128xf32>
    %65 = vector.shape_cast %64 : vector<1x128xf32> to vector<1x128xf32>
    %66 = vector.broadcast %65 : vector<1x128xf32> to vector<5x128xf32>
    %c2_72 = arith.constant 2 : index
    %c1_73 = arith.constant 1 : index
    %c0_74 = arith.constant 0 : index
    %c0_75 = arith.constant 0 : index
    %67 = vector.load %arg5[%c2_72, %c1_73, %c0_74, %c0_75] : memref<4x4x5x128xf32, #tpu.memory_space<vmem>>, vector<1x1x5x128xf32>
    %68 = vector.shape_cast %67 : vector<1x1x5x128xf32> to vector<5x128xf32>
    %69 = vector.shape_cast %66 : vector<5x128xf32> to vector<1x1x5x128xf32>
    tpu.vector_store %arg5[%c2_72, %c1_73, %c0_74, %c0_75], %69 {strides = array<i32>} : memref<4x4x5x128xf32, #tpu.memory_space<vmem>>, vector<1x1x5x128xf32>,
    %c0_76 = arith.constant 0 : index
    %c2_77 = arith.constant 2 : index
    %c2_78 = arith.constant 2 : index
    %c0_79 = arith.constant 0 : index
    %70 = vector.load %arg2[%c0_76, %c2_77, %c2_78, %c0_79] : memref<1x4x4x128xf32, #tpu.memory_space<vmem>>, vector<1x1x1x128xf32>
    %71 = vector.shape_cast %70 : vector<1x1x1x128xf32> to vector<1x128xf32>
    %72 = vector.shape_cast %71 : vector<1x128xf32> to vector<1x128xf32>
    %73 = vector.broadcast %72 : vector<1x128xf32> to vector<5x128xf32>
    %c2_80 = arith.constant 2 : index
    %c2_81 = arith.constant 2 : index
    %c0_82 = arith.constant 0 : index
    %c0_83 = arith.constant 0 : index
    %74 = vector.load %arg5[%c2_80, %c2_81, %c0_82, %c0_83] : memref<4x4x5x128xf32, #tpu.memory_space<vmem>>, vector<1x1x5x128xf32>
    %75 = vector.shape_cast %74 : vector<1x1x5x128xf32> to vector<5x128xf32>
    %76 = vector.shape_cast %73 : vector<5x128xf32> to vector<1x1x5x128xf32>
    tpu.vector_store %arg5[%c2_80, %c2_81, %c0_82, %c0_83], %76 {strides = array<i32>} : memref<4x4x5x128xf32, #tpu.memory_space<vmem>>, vector<1x1x5x128xf32>,
    %c0_84 = arith.constant 0 : index
    %c2_85 = arith.constant 2 : index
    %c3_86 = arith.constant 3 : index
    %c0_87 = arith.constant 0 : index
    %77 = vector.load %arg2[%c0_84, %c2_85, %c3_86, %c0_87] : memref<1x4x4x128xf32, #tpu.memory_space<vmem>>, vector<1x1x1x128xf32>
    %78 = vector.shape_cast %77 : vector<1x1x1x128xf32> to vector<1x128xf32>
    %79 = vector.shape_cast %78 : vector<1x128xf32> to vector<1x128xf32>
    %80 = vector.broadcast %79 : vector<1x128xf32> to vector<5x128xf32>
    %c2_88 = arith.constant 2 : index
    %c3_89 = arith.constant 3 : index
    %c0_90 = arith.constant 0 : index
    %c0_91 = arith.constant 0 : index
    %81 = vector.load %arg5[%c2_88, %c3_89, %c0_90, %c0_91] : memref<4x4x5x128xf32, #tpu.memory_space<vmem>>, vector<1x1x5x128xf32>
    %82 = vector.shape_cast %81 : vector<1x1x5x128xf32> to vector<5x128xf32>
    %83 = vector.shape_cast %80 : vector<5x128xf32> to vector<1x1x5x128xf32>
    tpu.vector_store %arg5[%c2_88, %c3_89, %c0_90, %c0_91], %83 {strides = array<i32>} : memref<4x4x5x128xf32, #tpu.memory_space<vmem>>, vector<1x1x5x128xf32>,
    %c0_92 = arith.constant 0 : index
    %c3_93 = arith.constant 3 : index
    %c0_94 = arith.constant 0 : index
    %c0_95 = arith.constant 0 : index
    %84 = vector.load %arg2[%c0_92, %c3_93, %c0_94, %c0_95] : memref<1x4x4x128xf32, #tpu.memory_space<vmem>>, vector<1x1x1x128xf32>
    %85 = vector.shape_cast %84 : vector<1x1x1x128xf32> to vector<1x128xf32>
    %86 = vector.shape_cast %85 : vector<1x128xf32> to vector<1x128xf32>
    %87 = vector.broadcast %86 : vector<1x128xf32> to vector<5x128xf32>
    %c3_96 = arith.constant 3 : index
    %c0_97 = arith.constant 0 : index
    %c0_98 = arith.constant 0 : index
    %c0_99 = arith.constant 0 : index
    %88 = vector.load %arg5[%c3_96, %c0_97, %c0_98, %c0_99] : memref<4x4x5x128xf32, #tpu.memory_space<vmem>>, vector<1x1x5x128xf32>
    %89 = vector.shape_cast %88 : vector<1x1x5x128xf32> to vector<5x128xf32>
    %90 = vector.shape_cast %87 : vector<5x128xf32> to vector<1x1x5x128xf32>
    tpu.vector_store %arg5[%c3_96, %c0_97, %c0_98, %c0_99], %90 {strides = array<i32>} : memref<4x4x5x128xf32, #tpu.memory_space<vmem>>, vector<1x1x5x128xf32>,
    %c0_100 = arith.constant 0 : index
    %c3_101 = arith.constant 3 : index
    %c1_102 = arith.constant 1 : index
    %c0_103 = arith.constant 0 : index
    %91 = vector.load %arg2[%c0_100, %c3_101, %c1_102, %c0_103] : memref<1x4x4x128xf32, #tpu.memory_space<vmem>>, vector<1x1x1x128xf32>
    %92 = vector.shape_cast %91 : vector<1x1x1x128xf32> to vector<1x128xf32>
    %93 = vector.shape_cast %92 : vector<1x128xf32> to vector<1x128xf32>
    %94 = vector.broadcast %93 : vector<1x128xf32> to vector<5x128xf32>
    %c3_104 = arith.constant 3 : index
    %c1_105 = arith.constant 1 : index
    %c0_106 = arith.constant 0 : index
    %c0_107 = arith.constant 0 : index
    %95 = vector.load %arg5[%c3_104, %c1_105, %c0_106, %c0_107] : memref<4x4x5x128xf32, #tpu.memory_space<vmem>>, vector<1x1x5x128xf32>
    %96 = vector.shape_cast %95 : vector<1x1x5x128xf32> to vector<5x128xf32>
    %97 = vector.shape_cast %94 : vector<5x128xf32> to vector<1x1x5x128xf32>
    tpu.vector_store %arg5[%c3_104, %c1_105, %c0_106, %c0_107], %97 {strides = array<i32>} : memref<4x4x5x128xf32, #tpu.memory_space<vmem>>, vector<1x1x5x128xf32>,
    %c0_108 = arith.constant 0 : index
    %c3_109 = arith.constant 3 : index
    %c2_110 = arith.constant 2 : index
    %c0_111 = arith.constant 0 : index
    %98 = vector.load %arg2[%c0_108, %c3_109, %c2_110, %c0_111] : memref<1x4x4x128xf32, #tpu.memory_space<vmem>>, vector<1x1x1x128xf32>
    %99 = vector.shape_cast %98 : vector<1x1x1x128xf32> to vector<1x128xf32>
    %100 = vector.shape_cast %99 : vector<1x128xf32> to vector<1x128xf32>
    %101 = vector.broadcast %100 : vector<1x128xf32> to vector<5x128xf32>
    %c3_112 = arith.constant 3 : index
    %c2_113 = arith.constant 2 : index
    %c0_114 = arith.constant 0 : index
    %c0_115 = arith.constant 0 : index
    %102 = vector.load %arg5[%c3_112, %c2_113, %c0_114, %c0_115] : memref<4x4x5x128xf32, #tpu.memory_space<vmem>>, vector<1x1x5x128xf32>
    %103 = vector.shape_cast %102 : vector<1x1x5x128xf32> to vector<5x128xf32>
    %104 = vector.shape_cast %101 : vector<5x128xf32> to vector<1x1x5x128xf32>
    tpu.vector_store %arg5[%c3_112, %c2_113, %c0_114, %c0_115], %104 {strides = array<i32>} : memref<4x4x5x128xf32, #tpu.memory_space<vmem>>, vector<1x1x5x128xf32>,
    %c0_116 = arith.constant 0 : index
    %c3_117 = arith.constant 3 : index
    %c3_118 = arith.constant 3 : index
    %c0_119 = arith.constant 0 : index
    %105 = vector.load %arg2[%c0_116, %c3_117, %c3_118, %c0_119] : memref<1x4x4x128xf32, #tpu.memory_space<vmem>>, vector<1x1x1x128xf32>
    %106 = vector.shape_cast %105 : vector<1x1x1x128xf32> to vector<1x128xf32>
    %107 = vector.shape_cast %106 : vector<1x128xf32> to vector<1x128xf32>
    %108 = vector.broadcast %107 : vector<1x128xf32> to vector<5x128xf32>
    %c3_120 = arith.constant 3 : index
    %c3_121 = arith.constant 3 : index
    %c0_122 = arith.constant 0 : index
    %c0_123 = arith.constant 0 : index
    %109 = vector.load %arg5[%c3_120, %c3_121, %c0_122, %c0_123] : memref<4x4x5x128xf32, #tpu.memory_space<vmem>>, vector<1x1x5x128xf32>
    %110 = vector.shape_cast %109 : vector<1x1x5x128xf32> to vector<5x128xf32>
    %111 = vector.shape_cast %108 : vector<5x128xf32> to vector<1x1x5x128xf32>
    tpu.vector_store %arg5[%c3_120, %c3_121, %c0_122, %c0_123], %111 {strides = array<i32>} : memref<4x4x5x128xf32, #tpu.memory_space<vmem>>, vector<1x1x5x128xf32>,
    %cst = arith.constant 0.000000e+00 : f32
    %112 = vector.broadcast %cst : f32 to vector<5x5x128xf32>
    %c0_124 = arith.constant 0 : index
    %c0_125 = arith.constant 0 : index
    %c0_126 = arith.constant 0 : index
    %c0_127 = arith.constant 0 : index
    %113 = vector.load %arg3[%c0_124, %c0_125, %c0_126, %c0_127] : memref<1x8x8x128xf32, #tpu.memory_space<vmem>>, vector<1x8x8x128xf32>
    %114 = vector.shape_cast %113 : vector<1x8x8x128xf32> to vector<8x8x128xf32>
    %115 = vector.extract_strided_slice %114 {offsets = [0, 0, 0], sizes = [8, 5, 128], strides = [1, 1, 1]} : vector<8x8x128xf32> to vector<8x5x128xf32>
    %116 = vector.extract_strided_slice %115 {offsets = [0, 0, 0], sizes = [5, 5, 128], strides = [1, 1, 1]} : vector<8x5x128xf32> to vector<5x5x128xf32>
    %c0_128 = arith.constant 0 : index
    %c0_129 = arith.constant 0 : index
    %c0_130 = arith.constant 0 : index
    %c0_131 = arith.constant 0 : index
    %117 = vector.load %arg5[%c0_128, %c0_129, %c0_130, %c0_131] : memref<4x4x5x128xf32, #tpu.memory_space<vmem>>, vector<1x1x5x128xf32>
    %118 = vector.shape_cast %117 : vector<1x1x5x128xf32> to vector<5x128xf32>
    %119 = vector.shape_cast %118 : vector<5x128xf32> to vector<1x5x128xf32>
    %120 = vector.broadcast %119 : vector<1x5x128xf32> to vector<5x5x128xf32>
    %121 = arith.mulf %116, %120 : vector<5x5x128xf32>
    %122 = arith.addf %112, %121 : vector<5x5x128xf32>
    %123 = vector.extract_strided_slice %115 {offsets = [1, 0, 0], sizes = [5, 5, 128], strides = [1, 1, 1]} : vector<8x5x128xf32> to vector<5x5x128xf32>
    %c1_132 = arith.constant 1 : index
    %c0_133 = arith.constant 0 : index
    %c0_134 = arith.constant 0 : index
    %c0_135 = arith.constant 0 : index
    %124 = vector.load %arg5[%c1_132, %c0_133, %c0_134, %c0_135] : memref<4x4x5x128xf32, #tpu.memory_space<vmem>>, vector<1x1x5x128xf32>
    %125 = vector.shape_cast %124 : vector<1x1x5x128xf32> to vector<5x128xf32>
    %126 = vector.shape_cast %125 : vector<5x128xf32> to vector<1x5x128xf32>
    %127 = vector.broadcast %126 : vector<1x5x128xf32> to vector<5x5x128xf32>
    %128 = arith.mulf %123, %127 : vector<5x5x128xf32>
    %129 = arith.addf %122, %128 : vector<5x5x128xf32>
    %130 = vector.extract_strided_slice %115 {offsets = [2, 0, 0], sizes = [5, 5, 128], strides = [1, 1, 1]} : vector<8x5x128xf32> to vector<5x5x128xf32>
    %c2_136 = arith.constant 2 : index
    %c0_137 = arith.constant 0 : index
    %c0_138 = arith.constant 0 : index
    %c0_139 = arith.constant 0 : index
    %131 = vector.load %arg5[%c2_136, %c0_137, %c0_138, %c0_139] : memref<4x4x5x128xf32, #tpu.memory_space<vmem>>, vector<1x1x5x128xf32>
    %132 = vector.shape_cast %131 : vector<1x1x5x128xf32> to vector<5x128xf32>
    %133 = vector.shape_cast %132 : vector<5x128xf32> to vector<1x5x128xf32>
    %134 = vector.broadcast %133 : vector<1x5x128xf32> to vector<5x5x128xf32>
    %135 = arith.mulf %130, %134 : vector<5x5x128xf32>
    %136 = arith.addf %129, %135 : vector<5x5x128xf32>
    %137 = vector.extract_strided_slice %115 {offsets = [3, 0, 0], sizes = [5, 5, 128], strides = [1, 1, 1]} : vector<8x5x128xf32> to vector<5x5x128xf32>
    %c3_140 = arith.constant 3 : index
    %c0_141 = arith.constant 0 : index
    %c0_142 = arith.constant 0 : index
    %c0_143 = arith.constant 0 : index
    %138 = vector.load %arg5[%c3_140, %c0_141, %c0_142, %c0_143] : memref<4x4x5x128xf32, #tpu.memory_space<vmem>>, vector<1x1x5x128xf32>
    %139 = vector.shape_cast %138 : vector<1x1x5x128xf32> to vector<5x128xf32>
    %140 = vector.shape_cast %139 : vector<5x128xf32> to vector<1x5x128xf32>
    %141 = vector.broadcast %140 : vector<1x5x128xf32> to vector<5x5x128xf32>
    %142 = arith.mulf %137, %141 : vector<5x5x128xf32>
    %143 = arith.addf %136, %142 : vector<5x5x128xf32>
    %c0_144 = arith.constant 0 : index
    %c0_145 = arith.constant 0 : index
    %c0_146 = arith.constant 0 : index
    %c0_147 = arith.constant 0 : index
    %144 = vector.load %arg3[%c0_144, %c0_145, %c0_146, %c0_147] : memref<1x8x8x128xf32, #tpu.memory_space<vmem>>, vector<1x8x8x128xf32>
    %145 = vector.shape_cast %144 : vector<1x8x8x128xf32> to vector<8x8x128xf32>
    %c7_i32 = arith.constant 7 : i32
    %146 = tpu.dynamic_rotate %145 by %c7_i32 dim 1 : vector<8x8x128xf32>, i32 -> vector<8x8x128xf32>
    %147 = vector.extract_strided_slice %146 {offsets = [0, 0, 0], sizes = [8, 5, 128], strides = [1, 1, 1]} : vector<8x8x128xf32> to vector<8x5x128xf32>
    %148 = vector.extract_strided_slice %147 {offsets = [0, 0, 0], sizes = [5, 5, 128], strides = [1, 1, 1]} : vector<8x5x128xf32> to vector<5x5x128xf32>
    %c0_148 = arith.constant 0 : index
    %c1_149 = arith.constant 1 : index
    %c0_150 = arith.constant 0 : index
    %c0_151 = arith.constant 0 : index
    %149 = vector.load %arg5[%c0_148, %c1_149, %c0_150, %c0_151] : memref<4x4x5x128xf32, #tpu.memory_space<vmem>>, vector<1x1x5x128xf32>
    %150 = vector.shape_cast %149 : vector<1x1x5x128xf32> to vector<5x128xf32>
    %151 = vector.shape_cast %150 : vector<5x128xf32> to vector<1x5x128xf32>
    %152 = vector.broadcast %151 : vector<1x5x128xf32> to vector<5x5x128xf32>
    %153 = arith.mulf %148, %152 : vector<5x5x128xf32>
    %154 = arith.addf %143, %153 : vector<5x5x128xf32>
    %155 = vector.extract_strided_slice %147 {offsets = [1, 0, 0], sizes = [5, 5, 128], strides = [1, 1, 1]} : vector<8x5x128xf32> to vector<5x5x128xf32>
    %c1_152 = arith.constant 1 : index
    %c1_153 = arith.constant 1 : index
    %c0_154 = arith.constant 0 : index
    %c0_155 = arith.constant 0 : index
    %156 = vector.load %arg5[%c1_152, %c1_153, %c0_154, %c0_155] : memref<4x4x5x128xf32, #tpu.memory_space<vmem>>, vector<1x1x5x128xf32>
    %157 = vector.shape_cast %156 : vector<1x1x5x128xf32> to vector<5x128xf32>
    %158 = vector.shape_cast %157 : vector<5x128xf32> to vector<1x5x128xf32>
    %159 = vector.broadcast %158 : vector<1x5x128xf32> to vector<5x5x128xf32>
    %160 = arith.mulf %155, %159 : vector<5x5x128xf32>
    %161 = arith.addf %154, %160 : vector<5x5x128xf32>
    %162 = vector.extract_strided_slice %147 {offsets = [2, 0, 0], sizes = [5, 5, 128], strides = [1, 1, 1]} : vector<8x5x128xf32> to vector<5x5x128xf32>
    %c2_156 = arith.constant 2 : index
    %c1_157 = arith.constant 1 : index
    %c0_158 = arith.constant 0 : index
    %c0_159 = arith.constant 0 : index
    %163 = vector.load %arg5[%c2_156, %c1_157, %c0_158, %c0_159] : memref<4x4x5x128xf32, #tpu.memory_space<vmem>>, vector<1x1x5x128xf32>
    %164 = vector.shape_cast %163 : vector<1x1x5x128xf32> to vector<5x128xf32>
    %165 = vector.shape_cast %164 : vector<5x128xf32> to vector<1x5x128xf32>
    %166 = vector.broadcast %165 : vector<1x5x128xf32> to vector<5x5x128xf32>
    %167 = arith.mulf %162, %166 : vector<5x5x128xf32>
    %168 = arith.addf %161, %167 : vector<5x5x128xf32>
    %169 = vector.extract_strided_slice %147 {offsets = [3, 0, 0], sizes = [5, 5, 128], strides = [1, 1, 1]} : vector<8x5x128xf32> to vector<5x5x128xf32>
    %c3_160 = arith.constant 3 : index
    %c1_161 = arith.constant 1 : index
    %c0_162 = arith.constant 0 : index
    %c0_163 = arith.constant 0 : index
    %170 = vector.load %arg5[%c3_160, %c1_161, %c0_162, %c0_163] : memref<4x4x5x128xf32, #tpu.memory_space<vmem>>, vector<1x1x5x128xf32>
    %171 = vector.shape_cast %170 : vector<1x1x5x128xf32> to vector<5x128xf32>
    %172 = vector.shape_cast %171 : vector<5x128xf32> to vector<1x5x128xf32>
    %173 = vector.broadcast %172 : vector<1x5x128xf32> to vector<5x5x128xf32>
    %174 = arith.mulf %169, %173 : vector<5x5x128xf32>
    %175 = arith.addf %168, %174 : vector<5x5x128xf32>
    %c0_164 = arith.constant 0 : index
    %c0_165 = arith.constant 0 : index
    %c0_166 = arith.constant 0 : index
    %c0_167 = arith.constant 0 : index
    %176 = vector.load %arg3[%c0_164, %c0_165, %c0_166, %c0_167] : memref<1x8x8x128xf32, #tpu.memory_space<vmem>>, vector<1x8x8x128xf32>
    %177 = vector.shape_cast %176 : vector<1x8x8x128xf32> to vector<8x8x128xf32>
    %c6_i32 = arith.constant 6 : i32
    %178 = tpu.dynamic_rotate %177 by %c6_i32 dim 1 : vector<8x8x128xf32>, i32 -> vector<8x8x128xf32>
    %179 = vector.extract_strided_slice %178 {offsets = [0, 0, 0], sizes = [8, 5, 128], strides = [1, 1, 1]} : vector<8x8x128xf32> to vector<8x5x128xf32>
    %180 = vector.extract_strided_slice %179 {offsets = [0, 0, 0], sizes = [5, 5, 128], strides = [1, 1, 1]} : vector<8x5x128xf32> to vector<5x5x128xf32>
    %c0_168 = arith.constant 0 : index
    %c2_169 = arith.constant 2 : index
    %c0_170 = arith.constant 0 : index
    %c0_171 = arith.constant 0 : index
    %181 = vector.load %arg5[%c0_168, %c2_169, %c0_170, %c0_171] : memref<4x4x5x128xf32, #tpu.memory_space<vmem>>, vector<1x1x5x128xf32>
    %182 = vector.shape_cast %181 : vector<1x1x5x128xf32> to vector<5x128xf32>
    %183 = vector.shape_cast %182 : vector<5x128xf32> to vector<1x5x128xf32>
    %184 = vector.broadcast %183 : vector<1x5x128xf32> to vector<5x5x128xf32>
    %185 = arith.mulf %180, %184 : vector<5x5x128xf32>
    %186 = arith.addf %175, %185 : vector<5x5x128xf32>
    %187 = vector.extract_strided_slice %179 {offsets = [1, 0, 0], sizes = [5, 5, 128], strides = [1, 1, 1]} : vector<8x5x128xf32> to vector<5x5x128xf32>
    %c1_172 = arith.constant 1 : index
    %c2_173 = arith.constant 2 : index
    %c0_174 = arith.constant 0 : index
    %c0_175 = arith.constant 0 : index
    %188 = vector.load %arg5[%c1_172, %c2_173, %c0_174, %c0_175] : memref<4x4x5x128xf32, #tpu.memory_space<vmem>>, vector<1x1x5x128xf32>
    %189 = vector.shape_cast %188 : vector<1x1x5x128xf32> to vector<5x128xf32>
    %190 = vector.shape_cast %189 : vector<5x128xf32> to vector<1x5x128xf32>
    %191 = vector.broadcast %190 : vector<1x5x128xf32> to vector<5x5x128xf32>
    %192 = arith.mulf %187, %191 : vector<5x5x128xf32>
    %193 = arith.addf %186, %192 : vector<5x5x128xf32>
    %194 = vector.extract_strided_slice %179 {offsets = [2, 0, 0], sizes = [5, 5, 128], strides = [1, 1, 1]} : vector<8x5x128xf32> to vector<5x5x128xf32>
    %c2_176 = arith.constant 2 : index
    %c2_177 = arith.constant 2 : index
    %c0_178 = arith.constant 0 : index
    %c0_179 = arith.constant 0 : index
    %195 = vector.load %arg5[%c2_176, %c2_177, %c0_178, %c0_179] : memref<4x4x5x128xf32, #tpu.memory_space<vmem>>, vector<1x1x5x128xf32>
    %196 = vector.shape_cast %195 : vector<1x1x5x128xf32> to vector<5x128xf32>
    %197 = vector.shape_cast %196 : vector<5x128xf32> to vector<1x5x128xf32>
    %198 = vector.broadcast %197 : vector<1x5x128xf32> to vector<5x5x128xf32>
    %199 = arith.mulf %194, %198 : vector<5x5x128xf32>
    %200 = arith.addf %193, %199 : vector<5x5x128xf32>
    %201 = vector.extract_strided_slice %179 {offsets = [3, 0, 0], sizes = [5, 5, 128], strides = [1, 1, 1]} : vector<8x5x128xf32> to vector<5x5x128xf32>
    %c3_180 = arith.constant 3 : index
    %c2_181 = arith.constant 2 : index
    %c0_182 = arith.constant 0 : index
    %c0_183 = arith.constant 0 : index
    %202 = vector.load %arg5[%c3_180, %c2_181, %c0_182, %c0_183] : memref<4x4x5x128xf32, #tpu.memory_space<vmem>>, vector<1x1x5x128xf32>
    %203 = vector.shape_cast %202 : vector<1x1x5x128xf32> to vector<5x128xf32>
    %204 = vector.shape_cast %203 : vector<5x128xf32> to vector<1x5x128xf32>
    %205 = vector.broadcast %204 : vector<1x5x128xf32> to vector<5x5x128xf32>
    %206 = arith.mulf %201, %205 : vector<5x5x128xf32>
    %207 = arith.addf %200, %206 : vector<5x5x128xf32>
    %c0_184 = arith.constant 0 : index
    %c0_185 = arith.constant 0 : index
    %c0_186 = arith.constant 0 : index
    %c0_187 = arith.constant 0 : index
    %208 = vector.load %arg3[%c0_184, %c0_185, %c0_186, %c0_187] : memref<1x8x8x128xf32, #tpu.memory_space<vmem>>, vector<1x8x8x128xf32>
    %209 = vector.shape_cast %208 : vector<1x8x8x128xf32> to vector<8x8x128xf32>
    %c5_i32 = arith.constant 5 : i32
    %210 = tpu.dynamic_rotate %209 by %c5_i32 dim 1 : vector<8x8x128xf32>, i32 -> vector<8x8x128xf32>
    %211 = vector.extract_strided_slice %210 {offsets = [0, 0, 0], sizes = [8, 5, 128], strides = [1, 1, 1]} : vector<8x8x128xf32> to vector<8x5x128xf32>
    %212 = vector.extract_strided_slice %211 {offsets = [0, 0, 0], sizes = [5, 5, 128], strides = [1, 1, 1]} : vector<8x5x128xf32> to vector<5x5x128xf32>
    %c0_188 = arith.constant 0 : index
    %c3_189 = arith.constant 3 : index
    %c0_190 = arith.constant 0 : index
    %c0_191 = arith.constant 0 : index
    %213 = vector.load %arg5[%c0_188, %c3_189, %c0_190, %c0_191] : memref<4x4x5x128xf32, #tpu.memory_space<vmem>>, vector<1x1x5x128xf32>
    %214 = vector.shape_cast %213 : vector<1x1x5x128xf32> to vector<5x128xf32>
    %215 = vector.shape_cast %214 : vector<5x128xf32> to vector<1x5x128xf32>
    %216 = vector.broadcast %215 : vector<1x5x128xf32> to vector<5x5x128xf32>
    %217 = arith.mulf %212, %216 : vector<5x5x128xf32>
    %218 = arith.addf %207, %217 : vector<5x5x128xf32>
    %219 = vector.extract_strided_slice %211 {offsets = [1, 0, 0], sizes = [5, 5, 128], strides = [1, 1, 1]} : vector<8x5x128xf32> to vector<5x5x128xf32>
    %c1_192 = arith.constant 1 : index
    %c3_193 = arith.constant 3 : index
    %c0_194 = arith.constant 0 : index
    %c0_195 = arith.constant 0 : index
    %220 = vector.load %arg5[%c1_192, %c3_193, %c0_194, %c0_195] : memref<4x4x5x128xf32, #tpu.memory_space<vmem>>, vector<1x1x5x128xf32>
    %221 = vector.shape_cast %220 : vector<1x1x5x128xf32> to vector<5x128xf32>
    %222 = vector.shape_cast %221 : vector<5x128xf32> to vector<1x5x128xf32>
    %223 = vector.broadcast %222 : vector<1x5x128xf32> to vector<5x5x128xf32>
    %224 = arith.mulf %219, %223 : vector<5x5x128xf32>
    %225 = arith.addf %218, %224 : vector<5x5x128xf32>
    %226 = vector.extract_strided_slice %211 {offsets = [2, 0, 0], sizes = [5, 5, 128], strides = [1, 1, 1]} : vector<8x5x128xf32> to vector<5x5x128xf32>
    %c2_196 = arith.constant 2 : index
    %c3_197 = arith.constant 3 : index
    %c0_198 = arith.constant 0 : index
    %c0_199 = arith.constant 0 : index
    %227 = vector.load %arg5[%c2_196, %c3_197, %c0_198, %c0_199] : memref<4x4x5x128xf32, #tpu.memory_space<vmem>>, vector<1x1x5x128xf32>
    %228 = vector.shape_cast %227 : vector<1x1x5x128xf32> to vector<5x128xf32>
    %229 = vector.shape_cast %228 : vector<5x128xf32> to vector<1x5x128xf32>
    %230 = vector.broadcast %229 : vector<1x5x128xf32> to vector<5x5x128xf32>
    %231 = arith.mulf %226, %230 : vector<5x5x128xf32>
    %232 = arith.addf %225, %231 : vector<5x5x128xf32>
    %233 = vector.extract_strided_slice %211 {offsets = [3, 0, 0], sizes = [5, 5, 128], strides = [1, 1, 1]} : vector<8x5x128xf32> to vector<5x5x128xf32>
    %c3_200 = arith.constant 3 : index
    %c3_201 = arith.constant 3 : index
    %c0_202 = arith.constant 0 : index
    %c0_203 = arith.constant 0 : index
    %234 = vector.load %arg5[%c3_200, %c3_201, %c0_202, %c0_203] : memref<4x4x5x128xf32, #tpu.memory_space<vmem>>, vector<1x1x5x128xf32>
    %235 = vector.shape_cast %234 : vector<1x1x5x128xf32> to vector<5x128xf32>
    %236 = vector.shape_cast %235 : vector<5x128xf32> to vector<1x5x128xf32>
    %237 = vector.broadcast %236 : vector<1x5x128xf32> to vector<5x5x128xf32>
    %238 = arith.mulf %233, %237 : vector<5x5x128xf32>
    %239 = arith.addf %232, %238 : vector<5x5x128xf32>
    %c0_204 = arith.constant 0 : index
    %c0_205 = arith.constant 0 : index
    %c0_206 = arith.constant 0 : index
    %c0_207 = arith.constant 0 : index
    %240 = vector.load %arg4[%c0_204, %c0_205, %c0_206, %c0_207] : memref<1x5x5x128xf32, #tpu.memory_space<vmem>>, vector<1x5x5x128xf32>
    %241 = vector.shape_cast %240 : vector<1x5x5x128xf32> to vector<5x5x128xf32>
    %242 = vector.shape_cast %239 : vector<5x5x128xf32> to vector<1x5x5x128xf32>
    tpu.vector_store %arg4[%c0_204, %c0_205, %c0_206, %c0_207], %242 {strides = array<i32>} : memref<1x5x5x128xf32, #tpu.memory_space<vmem>>, vector<1x5x5x128xf32>,
    return
  }
  func.func @transform_0(%arg0: i32, %arg1: i32) -> (i32, i32, i32, i32) {
    %c0_i32 = arith.constant 0 : i32
    %c0_i32_0 = arith.constant 0 : i32
    %c0_i32_1 = arith.constant 0 : i32
    return %arg0, %c0_i32, %c0_i32_0, %arg1 : i32, i32, i32, i32
  }
  func.func @transform_1(%arg0: i32, %arg1: i32) -> (i32, i32, i32, i32) {
    %c0_i32 = arith.constant 0 : i32
    %c0_i32_0 = arith.constant 0 : i32
    %c0_i32_1 = arith.constant 0 : i32
    return %arg0, %c0_i32, %c0_i32_0, %arg1 : i32, i32, i32, i32
  }
  func.func @transform_2(%arg0: i32, %arg1: i32) -> (i32, i32, i32, i32) {
    %c0_i32 = arith.constant 0 : i32
    %c0_i32_0 = arith.constant 0 : i32
    %c0_i32_1 = arith.constant 0 : i32
    return %arg0, %c0_i32, %c0_i32_0, %arg1 : i32, i32, i32, i32
  }
}

</mosaic_0001>

<bundles_post_ra>
// kernel: mask_forward.1
= control target key start
LH: loop header
LB: loop body
LE: loop exit
PB: predicated region body
PF: predicated region fallthrough
CT: control target
= control target key end

     0   :  { %s740_s9 = smov 0   ;;  %s742_s10 = smov 0   ;;  %s1036_s0 = inlined_call_operand.vmem [shape: f32[2,4,4,128], index: 0, kind: input, shape index: {}]   ;;  %s1037_s1 = inlined_call_operand.vmem [shape: f32[2,8,8,128], index: 1, kind: input, shape index: {}]   ;;  %s1038_s2 = inlined_call_operand.vmem [shape: f32[2,5,5,128], index: 2, kind: output, shape index: {}]  }
   0x1   :  { %s744_s11 = smov 0  }
   0x2 LB: > { %s24_s12 = sadd.s32 1, %s719_s10  ;;  %p638_p0 = scmp.ge.s32.totalorder %s723_s11, 1  ;;  %s723_s11 = sphi %s744_s11, %s12_s11   ;;  %s719_s10 = sphi %s742_s10, %s1040_s10   ;;  %s715_s9 = sphi %s740_s9, %s1039_s9  }
   0x3   : > { %p26_p1 = scmp.ge.s32.totalorder %s24_s12, 2  ;;  %p146_p2 = scmp.lt.s32.totalorder %s723_s11, 3 }
   0x5   : > { %s1042_s12 = smov (%p26_p1, %s24_s12), 0  ;;  %p147_p3 = pnand %p638_p0, %p146_p2 }
   0x6   : > { %p182_p4 = scmp.lt.s32.totalorder (!%p147_p3), %s715_s9, 1 }
   0x7   : > { %150 = sbr.rel (%p147_p3) target bundleno = 92 (0x5c), region = 28 }
   0xe   : > { %s1044_s9 = smov (!%p182_p4, %s715_s9), 1 }
   0xf   : > { %s674_s13 = sshll.u32 %s1044_s9, 4  ;;  %s675_s17 = sshll.u32 %s1044_s9, 6 }
  0x10   : > { %s764_s16 = scalar_lea.vmem %s1036_s0, %s674_s13  ;;  %s782_s20 = scalar_lea.vmem %s1037_s1, %s675_s17 }
  0x11   : > { %v644_v0 = vld [vmem:[%s764_s16] ss:$0 sm:$0xff]  ;;  %v649_v1 = vld [vmem:[%s764_s16 + $0x4] ss:$0 sm:$0xff]  ;;  %v657_v2 = vld [vmem:[%s764_s16 + $0x8] ss:$0 sm:$0xff] }
  0x12   : > { %211 = vst [vmem:[#allocation2] sm:$0x1f] %v644_v0  ;;  %240 = vst [vmem:[#allocation2 + $0x20] sm:$0x1f] %v649_v1  ;;  %v665_v3 = vld [vmem:[%s764_s16 + $0xc] ss:$0 sm:$0xff] }
  0x13   : > { %269 = vst [vmem:[#allocation2 + $0x40] sm:$0x1f] %v657_v2  ;;  %v645_v4 = vld [vmem:[%s764_s16 + $0x1] ss:$0 sm:$0xff]  ;;  %v651_v5 = vld [vmem:[%s764_s16 + $0x5] ss:$0 sm:$0xff] }
  0x14   : > { %298 = vst [vmem:[#allocation2 + $0x60] sm:$0x1f] %v665_v3  ;;  %218 = vst [vmem:[#allocation2 + $0x8] sm:$0x1f] %v645_v4  ;;  %v659_v6 = vld [vmem:[%s764_s16 + $0x9] ss:$0 sm:$0xff] }
  0x15   : > { %247 = vst [vmem:[#allocation2 + $0x28] sm:$0x1f] %v651_v5  ;;  %v667_v7 = vld [vmem:[%s764_s16 + $0xd] ss:$0 sm:$0xff]  ;;  %v646_v8 = vld [vmem:[%s764_s16 + $0x2] ss:$0 sm:$0xff] }
  0x16   : > { %276 = vst [vmem:[#allocation2 + $0x48] sm:$0x1f] %v659_v6  ;;  %305 = vst [vmem:[#allocation2 + $0x68] sm:$0x1f] %v667_v7  ;;  %v653_v9 = vld [vmem:[%s764_s16 + $0x6] ss:$0 sm:$0xff] }
  0x17   : > { %225 = vst [vmem:[#allocation2 + $0x10] sm:$0x1f] %v646_v8  ;;  %v661_v10 = vld [vmem:[%s764_s16 + $0xa] ss:$0 sm:$0xff]  ;;  %v669_v11 = vld [vmem:[%s764_s16 + $0xe] ss:$0 sm:$0xff] }
  0x18   : > { %254 = vst [vmem:[#allocation2 + $0x30] sm:$0x1f] %v653_v9  ;;  %283 = vst [vmem:[#allocation2 + $0x50] sm:$0x1f] %v661_v10  ;;  %v647_v12 = vld [vmem:[%s764_s16 + $0x3] ss:$0 sm:$0xff] }
  0x19   : > { %312 = vst [vmem:[#allocation2 + $0x70] sm:$0x1f] %v669_v11  ;;  %v655_v13 = vld [vmem:[%s764_s16 + $0x7] ss:$0 sm:$0xff]  ;;  %v663_v14 = vld [vmem:[%s764_s16 + $0xb] ss:$0 sm:$0xff] }
  0x1a   : > { %232 = vst [vmem:[#allocation2 + $0x18] sm:$0x1f] %v647_v12  ;;  %261 = vst [vmem:[#allocation2 + $0x38] sm:$0x1f] %v655_v13  ;;  %v671_v15 = vld [vmem:[%s764_s16 + $0xf] ss:$0 sm:$0xff] }
  0x1b   : > { %290 = vst [vmem:[#allocation2 + $0x58] sm:$0x1f] %v663_v14  ;;  %319 = vst [vmem:[#allocation2 + $0x78] sm:$0x1f] %v671_v15  ;;  %v789_v16 = vld [vmem:[%s782_s20] sm:$0xff]  ;;  %v792_v17 = vld [vmem:[%s782_s20 + $0x8] sm:$0xff] }
  0x1c   : > { %v322_v18 = vld [vmem:[%s782_s20 + $0x10] sm:$0xff]  ;;  %v795_v19 = vld [vmem:[#allocation2 + $0x40] sm:$0x1f]  ;;  %v804_v23 = vld [vmem:[%s782_s20 + $0x18] sm:$0xff]  ;;  %v372_v27 = vrot.slane %v789_v16, 1  ;;  %v373_v34 = vrot.slane %v792_v17, 1 }
  0x1d   : > { %v797_v20 = vld [vmem:[#allocation2] sm:$0x1f]  ;;  %v351_v29 = vmul.f32 %v795_v19, %v322_v18  ;;  %v352_v30 = vmul.f32 %v795_v19, %v804_v23  ;;  %v817_v31 = vld [vmem:[#allocation2 + $0x8] sm:$0x1f]  ;;  %v374_v40 = vrot.slane %v322_v18, 1  ;;  %v424_v42 = vrot.slane %v789_v16, 2 }
  0x1e   : > { %v799_v21 = vld [vmem:[#allocation2 + $0x20] sm:$0x1f]  ;;  %v329_v24 = vmul.f32 %v797_v20, %v789_v16  ;;  %v330_v25 = vmul.f32 %v797_v20, %v792_v17  ;;  %v822_v36 = vld [vmem:[#allocation2 + $0x28] sm:$0x1f]  ;;  %v381_v38 = vmul.f32 %v817_v31, %v372_v27  ;;  %v382_v45 = vmul.f32 %v817_v31, %v373_v34  ;;  %v835_v48 = vld [vmem:[#allocation2 + $0x10] sm:$0x1f] }
  0x1f   : > { %v801_v22 = vld [vmem:[#allocation2 + $0x60] sm:$0x1f]  ;;  %v340_v26 = vmul.f32 %v799_v21, %v792_v17  ;;  %v341_v28 = vmul.f32 %v799_v21, %v322_v18  ;;  %v825_v41 = vld [vmem:[#allocation2 + $0x48] sm:$0x1f]  ;;  %v392_v46 = vmul.f32 %v822_v36, %v373_v34  ;;  %v837_v49 = vld [vmem:[#allocation2 + $0x30] sm:$0x1f]  ;;  %v393_v60 = vmul.f32 %v822_v36, %v374_v40 }
  0x20   : > { %v362_v33 = vmul.f32 %v801_v22, %v804_v23  ;;  %v829_v43 = vld [vmem:[%s782_s20 + $0x20] sm:$0xff]  ;;  %v833_v47 = vld [vmem:[#allocation2 + $0x68] sm:$0x1f]  ;;  %v842_v51 = vrot.slane %v804_v23, 1  ;;  %v425_v52 = vrot.slane %v792_v17, 2  ;;  %v845_v53 = vrot.slane %v322_v18, 2 }
  0x21   : > { %v345_v32 = vadd.f32 %v340_v26, %v329_v24  ;;  %v346_v35 = vadd.f32 %v341_v28, %v330_v25  ;;  %v363_v50 = vmul.f32 %v801_v22, %v829_v43  ;;  %v848_v54 = vrot.slane %v804_v23, 2  ;;  %v851_v57 = vld [vmem:[#allocation2 + $0x50] sm:$0x1f]  ;;  %v872_v10 = vld [vmem:[#allocation2 + $0x18] sm:$0x1f]  ;;  %s676_s21 = smul.u32 40, %s1044_s9 }
  0x22   : > { %v403_v56 = vmul.f32 %v825_v41, %v374_v40  ;;  %v853_v58 = vld [vmem:[#allocation2 + $0x70] sm:$0x1f]  ;;  %v331_v61 = vmul.f32 %v797_v20, %v322_v18  ;;  %v414_v62 = vmul.f32 %v833_v47, %v842_v51  ;;  %v433_v63 = vmul.f32 %v835_v48, %v424_v42  ;;  %v874_v11 = vld [vmem:[#allocation2 + $0x38] sm:$0x1f] }
  0x23   : > { %v356_v37 = vadd.f32 %v351_v29, %v345_v32  ;;  %v357_v39 = vadd.f32 %v352_v30, %v346_v35  ;;  %v444_v0 = vmul.f32 %v837_v49, %v425_v52  ;;  %v862_v2 = vrot.slane %v829_v43, 1  ;;  %v891_v27 = vld [vmem:[#allocation2 + $0x58] sm:$0x1f]  ;;  %s965_s24 = scalar_lea.vmem %s1038_s2, %s676_s21 }
  0x24   : > { %v404_v4 = vmul.f32 %v825_v41, %v842_v51  ;;  %v455_v5 = vmul.f32 %v851_v57, %v845_v53  ;;  %v466_v6 = vmul.f32 %v853_v58, %v848_v54  ;;  %v476_v7 = vrot.slane %v789_v16, 3  ;;  %v893_v28 = vld [vmem:[#allocation2 + $0x78] sm:$0x1f] }
  0x25   : > { %v367_v44 = vadd.f32 %v362_v33, %v356_v37  ;;  %v368_v59 = vadd.f32 %v363_v50, %v357_v39  ;;  %v477_v8 = vrot.slane %v792_v17, 3  ;;  %v415_v13 = vmul.f32 %v833_v47, %v862_v2  ;;  %v887_v17 = vld [vmem:[%s782_s20 + $0x28] sm:$0xff] }
  0x26   : > { %v342_v14 = vmul.f32 %v799_v21, %v804_v23  ;;  %v880_v15 = vrot.slane %v322_v18, 3  ;;  %v883_v24 = vrot.slane %v804_v23, 3  ;;  %v434_v16 = vmul.f32 %v835_v48, %v425_v52 }
  0x27   : > { %v386_v55 = vadd.f32 %v381_v38, %v367_v44  ;;  %v387_v3 = vadd.f32 %v382_v45, %v368_v59  ;;  %v353_v25 = vmul.f32 %v795_v19, %v829_v43  ;;  %v364_v18 = vmul.f32 %v801_v22, %v887_v17 }
  0x28   : > { %v347_v30 = vadd.f32 %v342_v14, %v331_v61  ;;  %v485_v32 = vmul.f32 %v872_v10, %v476_v7  ;;  %v496_v33 = vmul.f32 %v874_v11, %v477_v8  ;;  %v900_v34 = vrot.slane %v829_v43, 2 }
  0x29   : > { %v397_v1 = vadd.f32 %v392_v46, %v386_v55  ;;  %v398_v12 = vadd.f32 %v393_v60, %v387_v3  ;;  %v445_v35 = vmul.f32 %v837_v49, %v845_v53  ;;  %v383_v42 = vmul.f32 %v817_v31, %v374_v40  ;;  %v925_v3 = vld [vmem:[%s782_s20 + $0x30] sm:$0xff] }
  0x2a   : > { %v358_v39 = vadd.f32 %v353_v25, %v347_v30  ;;  %v507_v44 = vmul.f32 %v891_v27, %v880_v15  ;;  %v518_v45 = vmul.f32 %v893_v28, %v883_v24  ;;  %v456_v46 = vmul.f32 %v851_v57, %v848_v54 }
  0x2b   : > { %v408_v9 = vadd.f32 %v403_v56, %v397_v1  ;;  %v409_v29 = vadd.f32 %v404_v4, %v398_v12  ;;  %v467_v50 = vmul.f32 %v853_v58, %v900_v34  ;;  %v394_v59 = vmul.f32 %v822_v36, %v842_v51 }
  0x2c   : > { %v369_v56 = vadd.f32 %v364_v18, %v358_v39  ;;  %v916_v40 = vrot.slane %v887_v17, 1  ;;  %v405_v60 = vmul.f32 %v825_v41, %v862_v2  ;;  %v332_v61 = vmul.f32 %v797_v20, %v804_v23 }
  0x2d   : > { %v419_v26 = vadd.f32 %v414_v62, %v408_v9  ;;  %v420_v38 = vadd.f32 %v415_v13, %v409_v29  ;;  %v343_v62 = vmul.f32 %v799_v21, %v829_v43  ;;  %v354_v4 = vmul.f32 %v795_v19, %v887_v17 }
  0x2e   : > { %v930_v7 = vrot.slane %v829_v43, 3  ;;  %v486_v9 = vmul.f32 %v872_v10, %v477_v8  ;;  %v365_v23 = vmul.f32 %v801_v22, %v925_v3  ;;  %v497_v25 = vmul.f32 %v874_v11, %v880_v15 }
  0x2f   : > { %v438_v37 = vadd.f32 %v433_v63, %v419_v26  ;;  %v439_v55 = vadd.f32 %v434_v16, %v420_v38  ;;  %v348_v12 = vadd.f32 %v343_v62, %v332_v61  ;;  %v416_v16 = vmul.f32 %v833_v47, %v916_v40 }
  0x30   : > { %v508_v26 = vmul.f32 %v891_v27, %v883_v24  ;;  %v384_v8 = vmul.f32 %v817_v31, %v842_v51  ;;  %v949_v38 = vrot.slane %v887_v17, 2  ;;  %v355_v62 = vmul.f32 %v795_v19, %v925_v3 }
  0x31   : > { %v449_v52 = vadd.f32 %v444_v0, %v438_v37  ;;  %v450_v1 = vadd.f32 %v445_v35, %v439_v55  ;;  %v388_v0 = vadd.f32 %v383_v42, %v369_v56  ;;  %v359_v29 = vadd.f32 %v354_v4, %v348_v12 }
  0x32   : > { %v519_v37 = vmul.f32 %v893_v28, %v930_v7  ;;  %v395_v42 = vmul.f32 %v822_v36, %v862_v2  ;;  %v406_v56 = vmul.f32 %v825_v41, %v916_v40  ;;  %v436_v19 = vmul.f32 %v835_v48, %v848_v54 }
  0x33   : > { %v460_v63 = vadd.f32 %v455_v5, %v449_v52  ;;  %v461_v14 = vadd.f32 %v456_v46, %v450_v1  ;;  %v399_v5 = vadd.f32 %v394_v59, %v388_v0  ;;  %v370_v39 = vadd.f32 %v365_v23, %v359_v29  ;;  %v971_v0 = vld [vmem:[%s782_s20 + $0x38] sm:$0xff] }
  0x34   : > { %v378_v52 = vrot.slane %v925_v3, 1  ;;  %v344_v23 = vmul.f32 %v799_v21, %v887_v17  ;;  %v447_v21 = vmul.f32 %v837_v49, %v900_v34 }
  0x35   : > { %v471_v13 = vadd.f32 %v466_v6, %v460_v63  ;;  %v472_v18 = vadd.f32 %v467_v50, %v461_v14  ;;  %v410_v35 = vadd.f32 %v405_v60, %v399_v5  ;;  %v435_v6 = vmul.f32 %v835_v48, %v845_v53 }
  0x36   : > { %v446_v50 = vmul.f32 %v837_v49, %v848_v54  ;;  %v457_v53 = vmul.f32 %v851_v57, %v900_v34  ;;  %v389_v55 = vadd.f32 %v384_v8, %v370_v39  ;;  %v417_v1 = vmul.f32 %v833_v47, %v378_v52 }
  0x37   : > { %v490_v30 = vadd.f32 %v485_v32, %v471_v13  ;;  %v491_v51 = vadd.f32 %v486_v9, %v472_v18  ;;  %v421_v32 = vadd.f32 %v416_v16, %v410_v35  ;;  %v487_v13 = vmul.f32 %v872_v10, %v880_v15 }
  0x38   : > { %v400_v63 = vadd.f32 %v395_v42, %v389_v55  ;;  %v498_v15 = vmul.f32 %v874_v11, %v883_v24  ;;  %v385_v54 = vmul.f32 %v817_v31, %v862_v2  ;;  %v509_v8 = vmul.f32 %v891_v27, %v930_v7 }
  0x39   : > { %v501_v46 = vadd.f32 %v496_v33, %v490_v30  ;;  %v502_v60 = vadd.f32 %v497_v25, %v491_v51  ;;  %v440_v61 = vadd.f32 %v435_v6, %v421_v32  ;;  %v468_v33 = vmul.f32 %v853_v58, %v949_v38 }
  0x3a   : > { %v411_v14 = vadd.f32 %v406_v56, %v400_v63  ;;  %v379_v6 = vrot.slane %v971_v0, 1 }
  0x3b   : > { %v512_v59 = vadd.f32 %v507_v44, %v501_v46  ;;  %v333_v44 = vmul.f32 %v797_v20, %v829_v43  ;;  %v513_v9 = vadd.f32 %v508_v26, %v502_v60  ;;  %v451_v12 = vadd.f32 %v446_v50, %v440_v61 }
  0x3c   : > { %v366_v20 = vmul.f32 %v801_v22, %v971_v0  ;;  %v481_v43 = vrot.slane %v887_v17, 3  ;;  %v430_v22 = vrot.slane %v925_v3, 2  ;;  %v458_v17 = vmul.f32 %v851_v57, %v949_v38 }
  0x3d   : > { %v523_v4 = vadd.f32 %v518_v45, %v512_v59  ;;  %v524_v5 = vadd.f32 %v519_v37, %v513_v9  ;;  %v462_v16 = vadd.f32 %v457_v53, %v451_v12  ;;  %v349_v25 = vadd.f32 %v344_v23, %v333_v44 }
  0x3e   : > { %v422_v45 = vadd.f32 %v417_v1, %v411_v14  ;;  %v396_v37 = vmul.f32 %v822_v36, %v916_v40  ;;  %v469_v42 = vmul.f32 %v853_v58, %v430_v22  ;;  %v520_v2 = vmul.f32 %v893_v28, %v481_v43 }
  0x3f   : > { %528 = vst [vmem:[%s965_s24] sm:$0x1f] %v523_v4  ;;  %529 = vst [vmem:[%s965_s24 + $0x8] sm:$0x1f] %v524_v5  ;;  %v473_v26 = vadd.f32 %v468_v33, %v462_v16  ;;  %v360_v29 = vadd.f32 %v355_v62, %v349_v25  ;;  %v407_v46 = vmul.f32 %v825_v41, %v378_v52  ;;  %v482_v41 = vrot.slane %v925_v3, 3 }
  0x40   : > { %v441_v30 = vadd.f32 %v436_v19, %v422_v45  ;;  %v488_v50 = vmul.f32 %v872_v10, %v883_v24  ;;  %v418_v56 = vmul.f32 %v833_v47, %v379_v6  ;;  %v499_v36 = vmul.f32 %v874_v11, %v930_v7 }
  0x41   : > { %v492_v18 = vadd.f32 %v487_v13, %v473_v26  ;;  %v371_v35 = vadd.f32 %v366_v20, %v360_v29  ;;  %v437_v61 = vmul.f32 %v835_v48, %v900_v34  ;;  %v510_v33 = vmul.f32 %v891_v27, %v481_v43 }
  0x42   : > { %v452_v39 = vadd.f32 %v447_v21, %v441_v30  ;;  %v431_v62 = vrot.slane %v971_v0, 2  ;;  %v448_v47 = vmul.f32 %v837_v49, %v949_v38  ;;  %v521_v1 = vmul.f32 %v893_v28, %v482_v41 }
  0x43   : > { %v503_v31 = vadd.f32 %v498_v15, %v492_v18  ;;  %v390_v51 = vadd.f32 %v385_v54, %v371_v35  ;;  %v459_v4 = vmul.f32 %v851_v57, %v430_v22  ;;  %v489_v23 = vmul.f32 %v872_v10, %v930_v7 }
  0x44   : > { %v463_v32 = vadd.f32 %v458_v17, %v452_v39  ;;  %v470_v3 = vmul.f32 %v853_v58, %v431_v62  ;;  %v483_v49 = vrot.slane %v971_v0, 3  ;;  %v500_v38 = vmul.f32 %v874_v11, %v481_v43 }
  0x45   : > { %v514_v53 = vadd.f32 %v509_v8, %v503_v31  ;;  %v401_v55 = vadd.f32 %v396_v37, %v390_v51  ;;  %v511_v19 = vmul.f32 %v891_v27, %v482_v41 }
  0x46   : > { %v474_v59 = vadd.f32 %v469_v42, %v463_v32  ;;  %v522_v5 = vmul.f32 %v893_v28, %v483_v49 }
  0x47   : > { %v525_v40 = vadd.f32 %v520_v2, %v514_v53  ;;  %v412_v60 = vadd.f32 %v407_v46, %v401_v55 }
  0x48   : > { %v493_v52 = vadd.f32 %v488_v50, %v474_v59 }
  0x49   : > { %530 = vst [vmem:[%s965_s24 + $0x10] sm:$0x1f] %v525_v40  ;;  %v423_v24 = vadd.f32 %v418_v56, %v412_v60 }
  0x4a   : > { %v504_v63 = vadd.f32 %v499_v36, %v493_v52 }
  0x4b   : > { %v442_v44 = vadd.f32 %v437_v61, %v423_v24 }
  0x4c   : > { %v515_v48 = vadd.f32 %v510_v33, %v504_v63 }
  0x4d   : > { %v453_v34 = vadd.f32 %v448_v47, %v442_v44 }
  0x4e   : > { %v526_v9 = vadd.f32 %v521_v1, %v515_v48 }
  0x4f   : > { %v464_v12 = vadd.f32 %v459_v4, %v453_v34 }
  0x50   : > { %531 = vst [vmem:[%s965_s24 + $0x18] sm:$0x1f] %v526_v9 }
  0x51   : > { %v475_v13 = vadd.f32 %v470_v3, %v464_v12 }
  0x53   : > { %v494_v14 = vadd.f32 %v489_v23, %v475_v13 }
  0x55   : > { %v505_v57 = vadd.f32 %v500_v38, %v494_v14 }
  0x57   : > { %v516_v16 = vadd.f32 %v511_v19, %v505_v57 }
  0x59   : > { %v527_v25 = vadd.f32 %v522_v5, %v516_v16 }
  0x5b   : > { %532 = vst [vmem:[%s965_s24 + $0x20] sm:$0x1f] %v527_v25 }
  0x5c PF: > { %s12_s11 = sadd.s32 1, %s723_s11   ;;  %s1039_s9 = smov %s719_s10 }
  0x5d   : > { %p9_p5 = scmp.ge.s32.totalorder %s12_s11, 4   ;;  %s1040_s10 = smov %s1042_s12 }
  0x5f   :  { %11 = sbr.rel (!%p9_p5) target bundleno = 2 (0x2), region = 79 }

</bundles_post_ra>
